<compile_context>
chip_gen: v7x
topology: tpu7x:2x2x1
jax: 0.10.0
libtpu: 0.0.40
codegen_flags: <defaults>
</compile_context>

<pallas_src>
import functools

import jax
import jax.numpy as jnp
from jax.experimental import pallas as pl
from jax.experimental.pallas import tpu as pltpu


# ---------------- pass 1: STN conv1 + global max over points ----------------

def _stn_max_kernel(x_ref, w1_ref, m_ref, *, n_total):
    """Per (batch, chunk) step: m_ref <- max(m_ref, max_n (W1 @ x_chunk)).

    x_ref : (1, 3, tn)   channels-first point chunk (lane axis = points)
    w1_ref: (128, 3)     stn.conv1 weight
    m_ref : (1, 128, 1)  running max of the RAW conv output; bias/relu are applied
                         once afterwards (max_n relu(z_n+b) == relu(max_n z_n + b)).
    """
    n = pl.program_id(1)
    tn = x_ref.shape[2]

    # K=3 contraction on the MXU; the VPU only handles the (rare) tail mask.
    h = jnp.dot(w1_ref[...], x_ref[0], preferred_element_type=jnp.float32)  # (128, tn)

    if n_total % tn != 0:  # static: padded tail columns must not win the max
        col = jax.lax.broadcasted_iota(jnp.int32, h.shape, 1) + n * tn
        h = jnp.where(col < n_total, h, -jnp.inf)

    m = jnp.max(h, axis=1, keepdims=True)                                   # (128, 1)

    @pl.when(n == 0)
    def _():
        m_ref[0] = m

    @pl.when(n > 0)
    def _():
        m_ref[0] = jnp.maximum(m_ref[0], m)


# ------------- pass 2: fused bmm + conv1 + relu, channels-last out ----------

def _point_conv_kernel(x_ref, weff_ref, b2_ref, o_ref):
    """out[n, f] = relu( sum_c W_eff[f, c] * x[c, n] + b2[f] ), stored channels-last.

    x_ref   : (1, 3, tn)
    weff_ref: (1, nfp, 3)  W_eff = W2 @ trans^T, zero-padded to nfp = ceil(n_feat/128)*128
    b2_ref  : (nfp, 1)
    o_ref   : (1, tn, n_feat)
    """
    n_feat = o_ref.shape[2]
    out = jnp.dot(weff_ref[0], x_ref[0], preferred_element_type=jnp.float32)  # (nfp, tn)
    out = jnp.maximum(out + b2_ref[...], 0.0)
    # (8,128)-aligned on-chip transpose (nfp, tn) -> (tn, nfp); keep the n_feat valid
    # feature columns and store channels-last -> no post-kernel HBM transpose.
    o_ref[0] = jnp.transpose(out)[:, :n_feat].astype(o_ref.dtype)


# ----------------------------- wrapper --------------------------------------

def _round_up(x, m):
    return ((x + m - 1) // m) * m


def mesh_encoder_forward(x, params):
    """x: (B, N, 3) float32 -> (B, N, n_feat) float32 (same layout as the torch module)."""
    B, N, _ = x.shape
    n_feat = params["b2"].shape[0]
    nfp = _round_up(n_feat, 128)

    # Channels-first x so both passes read lane-dense (3, tn) tiles.
    x_cf = jnp.swapaxes(x, 1, 2)                                   # (B, 3, N)

    # -------- pass 1: STN global max over N (tiled reduction) --------
    tn1 = N if N <= 512 else 512           # multiple of 128 whenever it tiles
    m = pl.pallas_call(
        functools.partial(_stn_max_kernel, n_total=N),
        out_shape=jax.ShapeDtypeStruct((B, 128, 1), jnp.float32),
        grid=(B, pl.cdiv(N, tn1)),
        in_specs=[
            pl.BlockSpec((1, 3, tn1), lambda b, n: (b, 0, n)),
            pl.BlockSpec((128, 3), lambda b, n: (0, 0)),
        ],
        out_specs=pl.BlockSpec((1, 128, 1), lambda b, n: (b, 0, 0)),
        compiler_params=pltpu.CompilerParams(
            dimension_semantics=("parallel", "arbitrary")),
    )(x_cf, params["w1"])

    # ------ tiny per-batch algebra: bias/relu + fc + identity + bmm fold ------
    g = jnp.maximum(m[:, :, 0] + params["b1"][None, :], 0.0)          # (B, 128)
    weff = jnp.einsum("fck,bk->bfc", params["a2"], g,
                      precision=jax.lax.Precision.HIGHEST) + params["c2"][None]
    weff = jnp.pad(weff, ((0, 0), (0, nfp - n_feat), (0, 0)))          # (B, nfp, 3)
    b2p = jnp.pad(params["b2"].reshape(n_feat, 1), ((0, nfp - n_feat), (0, 0)))

    # -------- pass 2: fused bmm + conv + relu, channels-last output --------
    tn2 = N if N <= 1024 else 1024
    out = pl.pallas_call(
        _point_conv_kernel,
        out_shape=jax.ShapeDtypeStruct((B, N, n_feat), jnp.float32),
        grid=(B, pl.cdiv(N, tn2)),
        in_specs=[
            pl.BlockSpec((1, 3, tn2), lambda b, n: (b, 0, n)),
            pl.BlockSpec((1, nfp, 3), lambda b, n: (b, 0, 0)),
            pl.BlockSpec((nfp, 1), lambda b, n: (0, 0)),
        ],
        out_specs=pl.BlockSpec((1, tn2, n_feat), lambda b, n: (b, n, 0)),
        compiler_params=pltpu.CompilerParams(
            dimension_semantics=("parallel", "parallel")),
    )(x_cf, weff, b2p)
    return out


# ----------------------------- parameters -----------------------------------

def init_raw_params(key, n_feat):
    """Synthetic parameters with the torch module's shapes (k=1 convs squeezed)."""
    k1, k2, k3, k4, k5, k6 = jax.random.split(key, 6)
    return {
        "w1": jax.random.normal(k1, (128, 3), jnp.float32) * 0.1,    # stn.conv1.weight
        "b1": jax.random.normal(k2, (128,), jnp.float32) * 0.1,      # stn.conv1.bias
        "wfc": jax.random.normal(k3, (9, 128), jnp.float32) * 0.05,  # stn.fc.weight
        "bfc": jax.random.normal(k4, (9,), jnp.float32) * 0.05,      # stn.fc.bias
        "w2": jax.random.normal(k5, (n_feat, 3), jnp.float32) * 0.1, # conv1.weight
        "b2": jax.random.normal(k6, (n_feat,), jnp.float32) * 0.1,   # conv1.bias
    }


def pack_params(raw):
    """One-time, weight-only preprocessing.

    Folds the flattened identity into the fc bias and the fc+bmm+conv algebra
    into A2/C2 so that W_eff[f, c] = sum_k A2[f, c, k] g[k] + C2[f, c].
    """
    identity = jnp.eye(3, dtype=jnp.float32).reshape(9)
    bfc_id = (raw["bfc"] + identity).reshape(3, 3)                 # [c, d]
    wfc_r = raw["wfc"].reshape(3, 3, 128)                          # [c, d, k]
    a2 = jnp.einsum("fd,cdk->fck", raw["w2"], wfc_r)               # (n_feat, 3, 128)
    c2 = jnp.einsum("fd,cd->fc", raw["w2"], bfc_id)                # (n_feat, 3)
    return {"w1": raw["w1"], "b1": raw["b1"], "a2": a2, "c2": c2, "b2": raw["b2"]}


# ----------------------------- reference ------------------------------------

def reference_forward(x, raw):
    """Pure-JAX transcription of the PyTorch forward (raw weights, no folding)."""
    hp = jax.lax.Precision.HIGHEST
    x_cf = jnp.swapaxes(x, 1, 2)                                     # (B, 3, N)
    h = jnp.maximum(jnp.einsum("cd,bdn->bcn", raw["w1"], x_cf, precision=hp)
                    + raw["b1"][None, :, None], 0.0)                 # (B, 128, N)
    g = jnp.max(h, axis=2)                                           # (B, 128)
    t9 = jnp.einsum("bk,ik->bi", g, raw["wfc"], precision=hp) + raw["bfc"]
    t9 = t9 + jnp.eye(3, dtype=jnp.float32).reshape(9)[None, :]
    trans = t9.reshape(-1, 3, 3)
    y = jnp.einsum("bnc,bcd->bnd", x, trans, precision=hp)           # torch.bmm
    out = jnp.einsum("fd,bnd->bnf", raw["w2"], y, precision=hp) + raw["b2"]
    return jnp.maximum(out, 0.0)


if __name__ == "__main__":
    B, N, n_feat = 2, 256, 32
    key = jax.random.PRNGKey(0)
    kx, kp = jax.random.split(key)
    x = jax.random.normal(kx, (B, N, 3), jnp.float32)

    raw = init_raw_params(kp, n_feat)
    params = pack_params(raw)

    out = mesh_encoder_forward(x, params)
    out = jax.block_until_ready(out)

    ref = reference_forward(x, raw)
    assert out.shape == (B, N, n_feat)
    err = float(jnp.max(jnp.abs(out - ref)))
    assert err < 1e-3, f"max abs err {err}"
    print("KERNEL_OK")
</pallas_src>

<mosaic_0001>
module attributes {stable_mosaic.version = 11 : i64} {
  func.func @_stn_max_kernel(%arg0: i32, %arg1: i32, %arg2: memref<1x3x256xf32, #tpu.memory_space<vmem>>, %arg3: memref<128x3xf32, #tpu.memory_space<vmem>>, %arg4: memref<1x128x1xf32, #tpu.memory_space<vmem>>) attributes {dimension_semantics = [#tpu.dimension_semantics<parallel>, #tpu.dimension_semantics<arbitrary>], iteration_bounds = array<i64: 2, 1>, scalar_prefetch = 0 : i64, scratch_operands = 0 : i64, tpu.core_type = #tpu.core_type<tc>, window_params = [{transform_indices = @transform_0, window_bounds = array<i64: 1, 3, 256>}, {pipeline_mode = #tpu.pipeline_mode<synchronous>, transform_indices = @transform_1, window_bounds = array<i64: 128, 3>}, {transform_indices = @transform_2, window_bounds = array<i64: 1, 128, 1>}]} {
    %c0 = arith.constant 0 : index
    %c0_0 = arith.constant 0 : index
    %0 = vector.load %arg3[%c0, %c0_0] : memref<128x3xf32, #tpu.memory_space<vmem>>, vector<128x3xf32>
    %c0_1 = arith.constant 0 : index
    %c0_2 = arith.constant 0 : index
    %c0_3 = arith.constant 0 : index
    %1 = vector.load %arg2[%c0_1, %c0_2, %c0_3] : memref<1x3x256xf32, #tpu.memory_space<vmem>>, vector<1x3x256xf32>
    %2 = vector.shape_cast %1 : vector<1x3x256xf32> to vector<3x256xf32>
    %cst = arith.constant dense<0.000000e+00> : vector<128x256xf32>
    %3 = tpu.matmul %0, %2, %cst {dimension_numbers = #tpu.dot_dimension_numbers<[1], [0], [0], [1], [0, 0, 1, 1], [], []>} : vector<128x3xf32>, vector<3x256xf32>, vector<128x256xf32> -> vector<128x256xf32>
    %cst_4 = arith.constant dense<0xFF800000> : vector<128xf32>
    %4 = vector.multi_reduction <maximumf>, %3, %cst_4 [1] : vector<128x256xf32> to vector<128xf32>
    %5 = vector.shape_cast %4 : vector<128xf32> to vector<128x1xf32>
    %c0_i32 = arith.constant 0 : i32
    %6 = arith.cmpi eq, %arg1, %c0_i32 : i32
    %7 = arith.extui %6 : i1 to i32
    %c0_i32_5 = arith.constant 0 : i32
    %8 = arith.cmpi ne, %7, %c0_i32_5 : i32
    scf.if %8 {
      %c0_8 = arith.constant 0 : index
      %c0_9 = arith.constant 0 : index
      %c0_10 = arith.constant 0 : index
      %12 = vector.load %arg4[%c0_8, %c0_9, %c0_10] : memref<1x128x1xf32, #tpu.memory_space<vmem>>, vector<1x128x1xf32>
      %13 = vector.shape_cast %12 : vector<1x128x1xf32> to vector<128x1xf32>
      %14 = vector.shape_cast %5 : vector<128x1xf32> to vector<1x128x1xf32>
      tpu.vector_store %arg4[%c0_8, %c0_9, %c0_10], %14 {strides = array<i32>} : memref<1x128x1xf32, #tpu.memory_space<vmem>>, vector<1x128x1xf32>,
    } else {
    }
    %c0_i32_6 = arith.constant 0 : i32
    %9 = arith.cmpi sgt, %arg1, %c0_i32_6 : i32
    %10 = arith.extui %9 : i1 to i32
    %c0_i32_7 = arith.constant 0 : i32
    %11 = arith.cmpi ne, %10, %c0_i32_7 : i32
    scf.if %11 {
      %c0_8 = arith.constant 0 : index
      %c0_9 = arith.constant 0 : index
      %c0_10 = arith.constant 0 : index
      %12 = vector.load %arg4[%c0_8, %c0_9, %c0_10] : memref<1x128x1xf32, #tpu.memory_space<vmem>>, vector<1x128x1xf32>
      %13 = vector.shape_cast %12 : vector<1x128x1xf32> to vector<128x1xf32>
      %14 = arith.maximumf %13, %5 : vector<128x1xf32>
      %c0_11 = arith.constant 0 : index
      %c0_12 = arith.constant 0 : index
      %c0_13 = arith.constant 0 : index
      %15 = vector.load %arg4[%c0_11, %c0_12, %c0_13] : memref<1x128x1xf32, #tpu.memory_space<vmem>>, vector<1x128x1xf32>
      %16 = vector.shape_cast %15 : vector<1x128x1xf32> to vector<128x1xf32>
      %17 = vector.shape_cast %14 : vector<128x1xf32> to vector<1x128x1xf32>
      tpu.vector_store %arg4[%c0_11, %c0_12, %c0_13], %17 {strides = array<i32>} : memref<1x128x1xf32, #tpu.memory_space<vmem>>, vector<1x128x1xf32>,
    } else {
    }
    return
  }
  func.func @transform_0(%arg0: i32, %arg1: i32) -> (i32, i32, i32) {
    %c0_i32 = arith.constant 0 : i32
    %c0_i32_0 = arith.constant 0 : i32
    return %arg0, %c0_i32, %arg1 : i32, i32, i32
  }
  func.func @transform_1(%arg0: i32, %arg1: i32) -> (i32, i32) {
    %c0_i32 = arith.constant 0 : i32
    %c0_i32_0 = arith.constant 0 : i32
    %c0_i32_1 = arith.constant 0 : i32
    return %c0_i32, %c0_i32_0 : i32, i32
  }
  func.func @transform_2(%arg0: i32, %arg1: i32) -> (i32, i32, i32) {
    %c0_i32 = arith.constant 0 : i32
    %c0_i32_0 = arith.constant 0 : i32
    %c0_i32_1 = arith.constant 0 : i32
    return %arg0, %c0_i32, %c0_i32_0 : i32, i32, i32
  }
}

</mosaic_0001>

<bundles_post_ra>
// kernel: tpu_custom_call.1
= control target key start
LH: loop header
LB: loop body
LE: loop exit
PB: predicated region body
PF: predicated region fallthrough
CT: control target
= control target key end

     0   :  { %s696_s9 = smov 0   ;;  %s698_s10 = smov 0   ;;  %s831_s0 = inlined_call_operand.vmem [shape: f32[2,3,256], index: 0, kind: input, shape index: {}]   ;;  %s832_s1 = inlined_call_operand.vmem [shape: f32[128,3], index: 1, kind: input, shape index: {}]   ;;  %s833_s2 = inlined_call_operand.vmem [shape: f32[2,128,1], index: 2, kind: output, shape index: {}]  }
   0x1   :  { %s700_s11 = smov 0  }
   0x2 LB: > { %s24_s12 = sadd.s32 1, %s674_s10  ;;  %p601_p0 = scmp.ge.s32.totalorder %s678_s11, 1  ;;  %s678_s11 = sphi %s700_s11, %s12_s11   ;;  %s674_s10 = sphi %s698_s10, %s835_s10   ;;  %s670_s9 = sphi %s696_s9, %s834_s9  }
   0x3   : > { %p26_p1 = scmp.ge.s32.totalorder %s24_s12, 2  ;;  %p131_p2 = scmp.lt.s32.totalorder %s678_s11, 3 }
   0x5   : > { %s837_s12 = smov (%p26_p1, %s24_s12), 0  ;;  %p132_p3 = pnand %p601_p0, %p131_p2 }
   0x6   : > { %p158_p4 = scmp.lt.s32.totalorder (!%p132_p3), %s670_s9, 1  ;;  %v680_v0 = vmov (!%p132_p3), 0.0   ;;  %vm240_vm0 = vcmask (!%p132_p3), 1042432   ;;  %v172_v3 = vld [vmem:[%s832_s1] sm:$0xff] (!%p132_p3)  ;;  %vm191_vm1 = vcmask (!%p132_p3), 23552   ;;  %v173_v5 = vld [vmem:[%s832_s1 + $0x8] sm:$0xff] (!%p132_p3) }
   0x7   : > { %135 = sbr.rel (%p132_p3) target bundleno = 412 (0x19c), region = 28  ;;  %309 = vmatprep.mubr.f32.mxu0 (!%p132_p3), %v680_v0  ;;  %357 = vmatprep.mubr.f32.mxu1 (!%p132_p3), %v680_v0  ;;  %v180_v4 = vld [vmem:[%s832_s1 + $0x40] sm:$0xff] (!%p132_p3)  ;;  %v181_v6 = vld [vmem:[%s832_s1 + $0x48] sm:$0xff] (!%p132_p3)  ;;  %v174_v7 = vld [vmem:[%s832_s1 + $0x10] sm:$0xff] (!%p132_p3)  ;;  %vm458_vm2 = vcmask (!%p132_p3), 7168  }
   0x8   : > { %v182_v8 = vld [vmem:[%s832_s1 + $0x50] sm:$0xff] (!%p132_p3)  ;;  %v175_v9 = vld [vmem:[%s832_s1 + $0x18] sm:$0xff] (!%p132_p3)  ;;  %v176_v11 = vld [vmem:[%s832_s1 + $0x20] sm:$0xff] (!%p132_p3) }
   0x9   : > { %v183_v10 = vld [vmem:[%s832_s1 + $0x58] sm:$0xff] (!%p132_p3)  ;;  %v184_v12 = vld [vmem:[%s832_s1 + $0x60] sm:$0xff] (!%p132_p3)  ;;  %v177_v13 = vld [vmem:[%s832_s1 + $0x28] sm:$0xff] (!%p132_p3) }
   0xa   : > { %v185_v14 = vld [vmem:[%s832_s1 + $0x68] sm:$0xff] (!%p132_p3)  ;;  %v178_v15 = vld [vmem:[%s832_s1 + $0x30] sm:$0xff] (!%p132_p3)  ;;  %v179_v17 = vld [vmem:[%s832_s1 + $0x38] sm:$0xff] (!%p132_p3) }
   0xb   : > { %v186_v16 = vld [vmem:[%s832_s1 + $0x70] sm:$0xff] (!%p132_p3)  ;;  %v187_v18 = vld [vmem:[%s832_s1 + $0x78] sm:$0xff] (!%p132_p3) }
   0xe   : > { %s839_s9 = smov (!%p158_p4, %s670_s9), 1 }
   0xf   : > { %s626_s13 = sshll.u32 %s839_s9, 3  ;;  %s627_s25 = sshll.u32 %s839_s9, 7 }
  0x10   : > { %s165_s16 = scalar_lea.vmem %s831_s0, %s626_s13  ;;  %s788_s28 = scalar_lea.vmem %s833_s2, %s627_s25 }
  0x11   : > { %v188_v1 = vld [vmem:[%s165_s16] sm:$0x77] }
  0x12   : > { %v190_v2 = vcombine.high %v188_v1, %v188_v1 }
  0x14   : > { %606 = vmatprep.subr.msk.mxu0 %vm240_vm0, %v190_v2  ;;  %628 = vmatprep.subr.msk.mxu1 %vm240_vm0, %v190_v2 }
  0x15   : > { %607 = vmatpush1.msk.msra.mxu0 %vm240_vm0, %v188_v1  ;;  %629 = vmatpush1.msk.msra.mxu1 %vm240_vm0, %v188_v1 }
  0x16   : > { %608 = vmatmul.mubr.msk.f32.vlgmr.msra.gmra.mrb[0].mxu0 %vm191_vm1, %v172_v3  ;;  %616 = vmatmul.mubr.msk.f32.vlgmr.msra.gmra.mrb[0].mxu1 %vm191_vm1, %v180_v4 }
  0x17   : > { %315 = vmatprep.mubr.f32.mxu0 %v680_v0  ;;  %363 = vmatprep.mubr.f32.mxu1 %v680_v0 }
  0x1a   : > { %609 = vmatmul.mubr.msk.f32.gmra.mrb[2].mxu0 %vm191_vm1, %v173_v5  ;;  %617 = vmatmul.mubr.msk.f32.gmra.mrb[2].mxu1 %vm191_vm1, %v181_v6 }
  0x1b   : > { %321 = vmatprep.mubr.f32.mxu0 %v680_v0  ;;  %369 = vmatprep.mubr.f32.mxu1 %v680_v0 }
  0x1e   : > { %610 = vmatmul.mubr.msk.f32.gmra.mrb[4].mxu0 %vm191_vm1, %v174_v7  ;;  %618 = vmatmul.mubr.msk.f32.gmra.mrb[4].mxu1 %vm191_vm1, %v182_v8 }
  0x1f   : > { %327 = vmatprep.mubr.f32.mxu0 %v680_v0  ;;  %375 = vmatprep.mubr.f32.mxu1 %v680_v0 }
  0x22   : > { %611 = vmatmul.mubr.msk.f32.gmra.mrb[6].mxu0 %vm191_vm1, %v175_v9  ;;  %619 = vmatmul.mubr.msk.f32.gmra.mrb[6].mxu1 %vm191_vm1, %v183_v10 }
  0x23   : > { %333 = vmatprep.mubr.f32.mxu0 %v680_v0  ;;  %381 = vmatprep.mubr.f32.mxu1 %v680_v0 }
  0x26   : > { %612 = vmatmul.mubr.msk.f32.gmra.mrb[8].mxu0 %vm191_vm1, %v176_v11  ;;  %620 = vmatmul.mubr.msk.f32.gmra.mrb[8].mxu1 %vm191_vm1, %v184_v12 }
  0x27   : > { %339 = vmatprep.mubr.f32.mxu0 %v680_v0  ;;  %387 = vmatprep.mubr.f32.mxu1 %v680_v0 }
  0x2a   : > { %613 = vmatmul.mubr.msk.f32.gmra.mrb[10].mxu0 %vm191_vm1, %v177_v13  ;;  %621 = vmatmul.mubr.msk.f32.gmra.mrb[10].mxu1 %vm191_vm1, %v185_v14 }
  0x2b   : > { %345 = vmatprep.mubr.f32.mxu0 %v680_v0  ;;  %393 = vmatprep.mubr.f32.mxu1 %v680_v0 }
  0x2e   : > { %614 = vmatmul.mubr.msk.f32.gmra.mrb[12].mxu0 %vm191_vm1, %v178_v15  ;;  %622 = vmatmul.mubr.msk.f32.gmra.mrb[12].mxu1 %vm191_vm1, %v186_v16 }
  0x2f   : > { %351 = vmatprep.mubr.f32.mxu0 %v680_v0  ;;  %399 = vmatprep.mubr.f32.mxu1 %v680_v0 }
  0x32   : > { %615 = vmatmul.mubr.msk.f32.gmra.mrb[14].mxu0 %vm191_vm1, %v179_v17  ;;  %623 = vmatmul.mubr.msk.f32.gmra.mrb[14].mxu1 %vm191_vm1, %v187_v18 }
  0xe9   : > { %v311_v19 = vpop.f32.mrb[0].mxu0  ;;  %v359_v20 = vpop.f32.mrb[0].mxu1 }
  0xea   : > { %v313_v21 = vpop.f32.mrb[1].mxu0  ;;  %v361_v22 = vpop.f32.mrb[1].mxu1 }
  0xeb   : > { %v430_v23 = vmax.f32 %v359_v20, %v361_v22  ;;  %v406_v24 = vmax.f32 %v311_v19, %v313_v21 }
  0xed   : > { %v365_v25 = vpop.f32.mrb[2].mxu1  ;;  %407 = vmax.xlane.f32.xlu0 %v406_v24  ;;  %v317_v26 = vpop.f32.mrb[2].mxu0 }
  0xee   : > { %v319_v27 = vpop.f32.mrb[3].mxu0  ;;  %v367_v28 = vpop.f32.mrb[3].mxu1 }
  0xef   : > { %v409_v29 = vmax.f32 %v317_v26, %v319_v27  ;;  %v433_v30 = vmax.f32 %v365_v25, %v367_v28 }
  0xf1   : > { %434 = vmax.xlane.f32.xlu1 %v433_v30  ;;  %431 = vmax.xlane.f32.xlu0 %v430_v23  ;;  %v323_v31 = vpop.f32.mrb[4].mxu0  ;;  %v371_v32 = vpop.f32.mrb[4].mxu1 }
  0xf2   : > { %v325_v33 = vpop.f32.mrb[5].mxu0  ;;  %v373_v34 = vpop.f32.mrb[5].mxu1 }
  0xf3   : > { %v412_v35 = vmax.f32 %v323_v31, %v325_v33  ;;  %v436_v36 = vmax.f32 %v371_v32, %v373_v34 }
  0xf5   : > { %410 = vmax.xlane.f32.xlu0 %v409_v29  ;;  %413 = vmax.xlane.f32.xlu1 %v412_v35  ;;  %v329_v37 = vpop.f32.mrb[6].mxu0  ;;  %v377_v38 = vpop.f32.mrb[6].mxu1 }
  0xf6   : > { %v331_v39 = vpop.f32.mrb[7].mxu0  ;;  %v379_v40 = vpop.f32.mrb[7].mxu1 }
  0xf7   : > { %v415_v41 = vmax.f32 %v329_v37, %v331_v39  ;;  %v439_v42 = vmax.f32 %v377_v38, %v379_v40 }
  0xf9   : > { %437 = vmax.xlane.f32.xlu0 %v436_v36  ;;  %416 = vmax.xlane.f32.xlu1 %v415_v41  ;;  %v335_v43 = vpop.f32.mrb[8].mxu0  ;;  %v383_v44 = vpop.f32.mrb[8].mxu1 }
  0xfa   : > { %v337_v45 = vpop.f32.mrb[9].mxu0  ;;  %v385_v46 = vpop.f32.mrb[9].mxu1 }
  0xfb   : > { %v418_v47 = vmax.f32 %v335_v43, %v337_v45  ;;  %v442_v48 = vmax.f32 %v383_v44, %v385_v46 }
  0xfd   : > { %440 = vmax.xlane.f32.xlu1 %v439_v42  ;;  %419 = vmax.xlane.f32.xlu0 %v418_v47  ;;  %v341_v49 = vpop.f32.mrb[10].mxu0  ;;  %v389_v50 = vpop.f32.mrb[10].mxu1 }
  0xfe   : > { %v343_v51 = vpop.f32.mrb[11].mxu0  ;;  %v391_v52 = vpop.f32.mrb[11].mxu1 }
  0xff   : > { %v421_v53 = vmax.f32 %v341_v49, %v343_v51  ;;  %v445_v54 = vmax.f32 %v389_v50, %v391_v52 }
 0x101   : > { %443 = vmax.xlane.f32.xlu0 %v442_v48  ;;  %422 = vmax.xlane.f32.xlu1 %v421_v53  ;;  %v347_v55 = vpop.f32.mrb[12].mxu0  ;;  %v395_v56 = vpop.f32.mrb[12].mxu1 }
 0x102   : > { %v349_v57 = vpop.f32.mrb[13].mxu0  ;;  %v397_v58 = vpop.f32.mrb[13].mxu1 }
 0x103   : > { %v424_v59 = vmax.f32 %v347_v55, %v349_v57  ;;  %v448_v60 = vmax.f32 %v395_v56, %v397_v58 }
 0x105   : > { %446 = vmax.xlane.f32.xlu1 %v445_v54  ;;  %425 = vmax.xlane.f32.xlu0 %v424_v59  ;;  %v353_v61 = vpop.f32.mrb[14].mxu0  ;;  %v401_v62 = vpop.f32.mrb[14].mxu1 }
 0x106   : > { %v355_v63 = vpop.f32.mrb[15].mxu0  ;;  %v403_v0 = vpop.f32.mrb[15].mxu1 }
 0x107   : > { %v427_v1 = vmax.f32 %v353_v61, %v355_v63  ;;  %v451_v2 = vmax.f32 %v401_v62, %v403_v0 }
 0x109   : > { %449 = vmax.xlane.f32.xlu0 %v448_v60  ;;  %428 = vmax.xlane.f32.xlu1 %v427_v1 }
 0x10d   : > { %452 = vmax.xlane.f32.xlu1 %v451_v2 }
 0x17a   : > { %v408_v3 = vpop.xlane.xlu0 %407 }
 0x17b   : > { %459 = vst.msk [vmem:[%s788_s28] sm:$0xff] %vm458_vm2, %v408_v3 }
 0x17e   : > { %v435_v4 = vpop.xlane.xlu1 %434  ;;  %v432_v5 = vpop.xlane.xlu0 %431 }
 0x17f   : > { %468 = vst.msk [vmem:[%s788_s28 + $0x48] sm:$0xff] %vm458_vm2, %v435_v4  ;;  %467 = vst.msk [vmem:[%s788_s28 + $0x40] sm:$0xff] %vm458_vm2, %v432_v5 }
 0x182   : > { %v411_v6 = vpop.xlane.xlu0 %410  ;;  %v414_v7 = vpop.xlane.xlu1 %413 }
 0x183   : > { %460 = vst.msk [vmem:[%s788_s28 + $0x8] sm:$0xff] %vm458_vm2, %v411_v6  ;;  %461 = vst.msk [vmem:[%s788_s28 + $0x10] sm:$0xff] %vm458_vm2, %v414_v7 }
 0x186   : > { %v438_v8 = vpop.xlane.xlu0 %437  ;;  %v417_v9 = vpop.xlane.xlu1 %416 }
 0x187   : > { %469 = vst.msk [vmem:[%s788_s28 + $0x50] sm:$0xff] %vm458_vm2, %v438_v8  ;;  %462 = vst.msk [vmem:[%s788_s28 + $0x18] sm:$0xff] %vm458_vm2, %v417_v9 }
 0x18a   : > { %v441_v10 = vpop.xlane.xlu1 %440  ;;  %v420_v11 = vpop.xlane.xlu0 %419 }
 0x18b   : > { %470 = vst.msk [vmem:[%s788_s28 + $0x58] sm:$0xff] %vm458_vm2, %v441_v10  ;;  %463 = vst.msk [vmem:[%s788_s28 + $0x20] sm:$0xff] %vm458_vm2, %v420_v11 }
 0x18e   : > { %v444_v12 = vpop.xlane.xlu0 %443  ;;  %v423_v13 = vpop.xlane.xlu1 %422 }
 0x18f   : > { %471 = vst.msk [vmem:[%s788_s28 + $0x60] sm:$0xff] %vm458_vm2, %v444_v12  ;;  %464 = vst.msk [vmem:[%s788_s28 + $0x28] sm:$0xff] %vm458_vm2, %v423_v13 }
 0x192   : > { %v447_v14 = vpop.xlane.xlu1 %446  ;;  %v426_v15 = vpop.xlane.xlu0 %425 }
 0x193   : > { %472 = vst.msk [vmem:[%s788_s28 + $0x68] sm:$0xff] %vm458_vm2, %v447_v14  ;;  %465 = vst.msk [vmem:[%s788_s28 + $0x30] sm:$0xff] %vm458_vm2, %v426_v15 }
 0x196   : > { %v450_v16 = vpop.xlane.xlu0 %449  ;;  %v429_v17 = vpop.xlane.xlu1 %428 }
 0x197   : > { %473 = vst.msk [vmem:[%s788_s28 + $0x70] sm:$0xff] %vm458_vm2, %v450_v16  ;;  %466 = vst.msk [vmem:[%s788_s28 + $0x38] sm:$0xff] %vm458_vm2, %v429_v17 }
 0x19a   : > { %v453_v18 = vpop.xlane.xlu1 %452 }
 0x19b   : > { %474 = vst.msk [vmem:[%s788_s28 + $0x78] sm:$0xff] %vm458_vm2, %v453_v18 }
 0x19c PF: > { %s12_s11 = sadd.s32 1, %s678_s11   ;;  %s834_s9 = smov %s674_s10 }
 0x19d   : > { %p9_p5 = scmp.ge.s32.totalorder %s12_s11, 4   ;;  %s835_s10 = smov %s837_s12 }
 0x19f   :  { %11 = sbr.rel (!%p9_p5) target bundleno = 2 (0x2), region = 66 }

</bundles_post_ra>
